<compile_context>
chip_gen: v7x
topology: tpu7x:2x2x1
jax: 0.10.0
libtpu: 0.0.40
codegen_flags: <defaults>
</compile_context>

<pallas_src>
import jax
import jax.numpy as jnp
from jax.experimental import pallas as pl
from jax.experimental.pallas import tpu as pltpu


def patch_embed_kernel(patches_ref, w_ref, pos_ref, out_ref):
    # patches_ref: (1, TM, K) bf16 -- TM seq rows of one batch (seq row 0 of a
    #              batch is the all-zero "cls" row, matmul contributes nothing)
    # w_ref:       (K, D)  bf16    -- projection weight, resident (constant index)
    # pos_ref:     (TM, D) f32     -- row 0 = cls + pos[0]; rows 1.. = pos + bias
    # out_ref:     (1, TM, D)
    acc = jnp.dot(patches_ref[0], w_ref[...],
                  preferred_element_type=jnp.float32)       # MXU, f32 accumulate
    out_ref[0] = (acc + pos_ref[...]).astype(out_ref.dtype)


def patch_embedding(x, w, bias, cls_token, pos_embed, *, patch_size,
                    tm_max=512, out_dtype=jnp.float32):
    """x: (B, C, H, W) f32; w: (D, C, P, P); bias: (D,);
    cls_token: (1, 1, D); pos_embed: (1, n+1, D).  Returns (B, n+1, D)."""
    B, C, H, W = x.shape
    P = patch_size
    nH, nW = H // P, W // P
    n = nH * nW
    D = w.shape[0]
    K = C * P * P
    N1 = n + 1

    # --- glue: NCHW -> (B, n, K) patch matrix, bf16 for the MXU ---------------
    # TODO(synk): fuse this rearrange into the kernel (DMA (C, P, W) strips of x
    # and relayout in VMEM) to remove this activation round trip through HBM.
    xb = x.astype(jnp.bfloat16)
    patches = xb.reshape(B, C, nH, P, nW, P).transpose(0, 2, 4, 1, 3, 5)
    patches = patches.reshape(B, n, K)

    # Fold the cls-token row into the matmul's seq axis: one all-zero K-row per
    # batch at seq position 0, so the kernel emits (B, n+1, D) directly and the
    # post-kernel concatenate disappears.
    patches_ext = jnp.concatenate(
        [jnp.zeros((B, 1, K), dtype=patches.dtype), patches], axis=1)  # (B, n+1, K)

    # conv weight (D, C, P, P) -> matmul weight (K, D), bf16 for the MXU.
    w_mat = w.reshape(D, K).T.astype(jnp.bfloat16)

    # Per-seq-row additive term, NOT replicated over batch: shape (n+1, D).
    #   row 0     = cls_token + pos_embed[0]
    #   rows 1..n = pos_embed[1:] + conv bias
    pos_all = jnp.concatenate(
        [cls_token.reshape(1, D) + pos_embed[0, 0:1, :],
         pos_embed[0, 1:, :] + bias[None, :]],
        axis=0).astype(jnp.float32)                                    # (n+1, D)

    # Keep K lane-dense (multiple of 128) so MXU columns / loads are unmasked.
    if K % 128:
        K_pad = ((K + 127) // 128) * 128
        patches_ext = jnp.pad(patches_ext, ((0, 0), (0, 0), (0, K_pad - K)))
        w_mat = jnp.pad(w_mat, ((0, K_pad - K), (0, 0)))
        K = K_pad
    # (D should likewise be a multiple of 128 in real configs; the demo D=32 is
    #  the full last dim so the store is legal, just lane-masked.)

    # --- tiling: seq axis by TM rows, batch as a second parallel grid axis ----
    # If n+1 fits in one tile, use the full extent (always a legal block shape);
    # otherwise TM = tm_max (multiple of 16) and Pallas masks the boundary
    # block's output writes -- no explicit pad copies.
    TM = N1 if N1 <= tm_max else tm_max
    grid = (pl.cdiv(N1, TM), B)   # batch innermost -> pos tile reused across B

    out = pl.pallas_call(
        patch_embed_kernel,
        out_shape=jax.ShapeDtypeStruct((B, N1, D), out_dtype),
        grid_spec=pltpu.PrefetchScalarGridSpec(
            num_scalar_prefetch=0,
            grid=grid,
            in_specs=[
                pl.BlockSpec((1, TM, K), lambda j, b: (b, j, 0)),   # patches (bf16)
                # Constant index -> weight fetched once, stays resident.
                # TODO(synk): on v7x with large K*D, single-buffer the weight
                # (pl.ANY + one-time manual copy) to free K*D*2 bytes of VMEM.
                pl.BlockSpec((K, D), lambda j, b: (0, 0)),          # weight (bf16)
                pl.BlockSpec((TM, D), lambda j, b: (j, 0)),         # pos/cls/bias
            ],
            out_specs=pl.BlockSpec((1, TM, D), lambda j, b: (b, j, 0)),
        ),
        compiler_params=pltpu.CompilerParams(
            dimension_semantics=("parallel", "parallel"),
            vmem_limit_bytes=32 * 1024 * 1024),
    )(patches_ext, w_mat, pos_all)
    return out


def reference(x, w, bias, cls_token, pos_embed, *, patch_size):
    """Pure-JAX f32 reference mirroring the PyTorch forward."""
    B, C, H, W = x.shape
    P = patch_size
    nH, nW = H // P, W // P
    D = w.shape[0]
    patches = x.reshape(B, C, nH, P, nW, P).transpose(0, 2, 4, 1, 3, 5)
    patches = patches.reshape(B, nH * nW, C * P * P)
    proj = jnp.einsum("bnk,dk->bnd", patches, w.reshape(D, -1)) + bias
    cls = jnp.broadcast_to(cls_token, (B, 1, D))
    out = jnp.concatenate([cls, proj], axis=1) + pos_embed
    return out


if __name__ == "__main__":
    # Small shapes consistent with the module: img_size=16, patch_size=8,
    # in_ch=4, embed_dim=32  ->  n_patches = (16//8)**2 = 4.
    B, C, IMG, P, D = 2, 4, 16, 8, 32
    n = (IMG // P) ** 2

    key = jax.random.PRNGKey(0)
    kx, kw, kb, kc, kp = jax.random.split(key, 5)
    x = jax.random.normal(kx, (B, C, IMG, IMG), dtype=jnp.float32)
    w = jax.random.normal(kw, (D, C, P, P), dtype=jnp.float32) * 0.02
    b = jax.random.normal(kb, (D,), dtype=jnp.float32) * 0.02
    cls_token = jax.random.normal(kc, (1, 1, D), dtype=jnp.float32) * 0.02
    pos_embed = jax.random.normal(kp, (1, n + 1, D), dtype=jnp.float32) * 0.02

    out = patch_embedding(x, w, b, cls_token, pos_embed, patch_size=P)
    out = jax.block_until_ready(out)

    ref = reference(x, w, b, cls_token, pos_embed, patch_size=P)
    assert out.shape == (B, n + 1, D), out.shape
    # bf16 matmul operands (input quantization + MXU rounding) with f32
    # accumulation -> slightly looser tolerance than pure f32.
    assert jnp.allclose(out, ref, atol=2e-2, rtol=2e-2), "mismatch vs reference"
    print("KERNEL_OK")
</pallas_src>

<mosaic_0001>
module attributes {stable_mosaic.version = 11 : i64} {
  func.func @patch_embed_kernel(%arg0: i32, %arg1: i32, %arg2: memref<1x5x256xbf16, #tpu.memory_space<vmem>>, %arg3: memref<256x32xbf16, #tpu.memory_space<vmem>>, %arg4: memref<5x32xf32, #tpu.memory_space<vmem>>, %arg5: memref<1x5x32xf32, #tpu.memory_space<vmem>>) attributes {dimension_semantics = [#tpu.dimension_semantics<parallel>, #tpu.dimension_semantics<parallel>], iteration_bounds = array<i64: 1, 2>, scalar_prefetch = 0 : i64, scratch_operands = 0 : i64, tpu.core_type = #tpu.core_type<tc>, window_params = [{transform_indices = @transform_0, window_bounds = array<i64: 1, 5, 256>}, {pipeline_mode = #tpu.pipeline_mode<synchronous>, transform_indices = @transform_1, window_bounds = array<i64: 256, 32>}, {transform_indices = @transform_2, window_bounds = array<i64: 5, 32>}, {transform_indices = @transform_3, window_bounds = array<i64: 1, 5, 32>}]} {
    %c0 = arith.constant 0 : index
    %c0_0 = arith.constant 0 : index
    %c0_1 = arith.constant 0 : index
    %0 = vector.load %arg2[%c0, %c0_0, %c0_1] : memref<1x5x256xbf16, #tpu.memory_space<vmem>>, vector<1x5x256xbf16>
    %1 = vector.shape_cast %0 : vector<1x5x256xbf16> to vector<5x256xbf16>
    %c0_2 = arith.constant 0 : index
    %c0_3 = arith.constant 0 : index
    %2 = vector.load %arg3[%c0_2, %c0_3] : memref<256x32xbf16, #tpu.memory_space<vmem>>, vector<256x32xbf16>
    %cst = arith.constant dense<0.000000e+00> : vector<5x32xf32>
    %3 = tpu.matmul %1, %2, %cst {dimension_numbers = #tpu.dot_dimension_numbers<[1], [0], [0], [1], [0, 0, 1, 1], [], []>} : vector<5x256xbf16>, vector<256x32xbf16>, vector<5x32xf32> -> vector<5x32xf32>
    %c0_4 = arith.constant 0 : index
    %c0_5 = arith.constant 0 : index
    %4 = vector.load %arg4[%c0_4, %c0_5] : memref<5x32xf32, #tpu.memory_space<vmem>>, vector<5x32xf32>
    %5 = arith.addf %3, %4 : vector<5x32xf32>
    %c0_6 = arith.constant 0 : index
    %c0_7 = arith.constant 0 : index
    %c0_8 = arith.constant 0 : index
    %6 = vector.load %arg5[%c0_6, %c0_7, %c0_8] : memref<1x5x32xf32, #tpu.memory_space<vmem>>, vector<1x5x32xf32>
    %7 = vector.shape_cast %6 : vector<1x5x32xf32> to vector<5x32xf32>
    %8 = vector.shape_cast %5 : vector<5x32xf32> to vector<1x5x32xf32>
    tpu.vector_store %arg5[%c0_6, %c0_7, %c0_8], %8 {strides = array<i32>} : memref<1x5x32xf32, #tpu.memory_space<vmem>>, vector<1x5x32xf32>,
    return
  }
  func.func @transform_0(%arg0: i32, %arg1: i32) -> (i32, i32, i32) {
    %c0_i32 = arith.constant 0 : i32
    %c0_i32_0 = arith.constant 0 : i32
    return %arg1, %arg0, %c0_i32 : i32, i32, i32
  }
  func.func @transform_1(%arg0: i32, %arg1: i32) -> (i32, i32) {
    %c0_i32 = arith.constant 0 : i32
    %c0_i32_0 = arith.constant 0 : i32
    %c0_i32_1 = arith.constant 0 : i32
    return %c0_i32, %c0_i32_0 : i32, i32
  }
  func.func @transform_2(%arg0: i32, %arg1: i32) -> (i32, i32) {
    %c0_i32 = arith.constant 0 : i32
    %c0_i32_0 = arith.constant 0 : i32
    return %arg0, %c0_i32 : i32, i32
  }
  func.func @transform_3(%arg0: i32, %arg1: i32) -> (i32, i32, i32) {
    %c0_i32 = arith.constant 0 : i32
    %c0_i32_0 = arith.constant 0 : i32
    return %arg1, %arg0, %c0_i32 : i32, i32, i32
  }
}

</mosaic_0001>

<bundles_post_ra>
// kernel: tpu_custom_call.1
= control target key start
LH: loop header
LB: loop body
LE: loop exit
PB: predicated region body
PF: predicated region fallthrough
CT: control target
= control target key end

     0   :  { %s634_s12 = smov 0   ;;  %s636_s13 = smov 0   ;;  %s725_s0 = inlined_call_operand.vmem [shape: bf16[2,5,256], index: 0, kind: input, shape index: {}]   ;;  %s726_s1 = inlined_call_operand.vmem [shape: bf16[256,32], index: 1, kind: input, shape index: {}]   ;;  %s727_s2 = inlined_call_operand.vmem [shape: f32[5,32], index: 2, kind: input, shape index: {}]   ;;  %s728_s3 = inlined_call_operand.vmem [shape: f32[2,5,32], index: 3, kind: output, shape index: {}]  }
   0x1   :  { %s638_s14 = smov 0  }
   0x2 LB: > { %s22_s15 = sadd.s32 1, %s608_s13  ;;  %p501_p0 = scmp.ge.s32.totalorder %s612_s14, 1  ;;  %s612_s14 = sphi %s638_s14, %s13_s14   ;;  %s608_s13 = sphi %s636_s13, %s730_s13   ;;  %s604_s12 = sphi %s634_s12, %s729_s12  }
   0x3   : > { %p23_p1 = scmp.ge.s32.totalorder %s22_s15, 2  ;;  %p166_p2 = scmp.lt.s32.totalorder %s612_s14, 3 }
   0x5   : > { %s732_s15 = smov (%p23_p1, %s22_s15), 0  ;;  %p167_p3 = pnand %p501_p0, %p166_p2 }
   0x6   : > { %v572_v0 = vld [vmem:[%s726_s1 + $0x40] sm:$0xff] (!%p167_p3)   ;;  %v574_v2 = vld [vmem:[%s726_s1 + $0x48] sm:$0xff] (!%p167_p3)   ;;  %p200_p4 = scmp.lt.s32.totalorder (!%p167_p3), %s604_s12, 1  ;;  %v576_v4 = vld [vmem:[%s726_s1 + $0x50] sm:$0xff] (!%p167_p3)   ;;  %vm398_vm0 = vcmask (!%p167_p3), 258048  }
   0x7   : > { %170 = sbr.rel (%p167_p3) target bundleno = 257 (0x101), region = 32  ;;  %v573_v1 = vld [vmem:[%s726_s1] sm:$0xff] (!%p167_p3)   ;;  %526 = vmatprep.subr.bf16.mxu0 (!%p167_p3), %v572_v0  ;;  %v575_v3 = vld [vmem:[%s726_s1 + $0x8] sm:$0xff] (!%p167_p3)   ;;  %v577_v5 = vld [vmem:[%s726_s1 + $0x10] sm:$0xff] (!%p167_p3)  }
   0x8   : > { %527 = vmatpush3.bf16.msra.mxu0 (!%p167_p3), %v573_v1  ;;  %v578_v6 = vld [vmem:[%s726_s1 + $0x58] sm:$0xff] (!%p167_p3)   ;;  %v580_v8 = vld [vmem:[%s726_s1 + $0x60] sm:$0xff] (!%p167_p3)   ;;  %v582_v10 = vld [vmem:[%s726_s1 + $0x68] sm:$0xff] (!%p167_p3)  }
   0x9   : > { %528 = vmatprep.subr.bf16.mxu0 (!%p167_p3), %v574_v2  ;;  %v579_v7 = vld [vmem:[%s726_s1 + $0x18] sm:$0xff] (!%p167_p3)   ;;  %v581_v9 = vld [vmem:[%s726_s1 + $0x20] sm:$0xff] (!%p167_p3)   ;;  %v583_v13 = vld [vmem:[%s726_s1 + $0x28] sm:$0xff] (!%p167_p3)  }
   0xa   : > { %v584_v14 = vld [vmem:[%s726_s1 + $0x70] sm:$0xff] (!%p167_p3)   ;;  %v586_v16 = vld [vmem:[%s726_s1 + $0x78] sm:$0xff] (!%p167_p3)   ;;  %v254_v20 = vld [vmem:[%s727_s2] sm:$0x1f] (!%p167_p3) }
   0xb   : > { %v585_v15 = vld [vmem:[%s726_s1 + $0x30] sm:$0xff] (!%p167_p3)   ;;  %v587_v17 = vld [vmem:[%s726_s1 + $0x38] sm:$0xff] (!%p167_p3)  }
   0xc   : > { %529 = vmatpush3.bf16.msra.mxu0 (!%p167_p3), %v575_v3 }
   0xd   : > { %530 = vmatprep.subr.bf16.mxu0 (!%p167_p3), %v576_v4 }
   0xe   : > { %s734_s12 = smov (!%p200_p4, %s604_s12), 1 }
   0xf   : > { %s525_s30 = sshll.u32 %s734_s12, 3 }
  0x10   : > { %531 = vmatpush3.bf16.msra.mxu0 %v577_v5  ;;  %s208_s10 = scalar_lea.vmem %s725_s0, %s525_s30  ;;  %s219_s7 = scalar_lea.vmem %s728_s3, %s525_s30 }
  0x11   : > { %532 = vmatprep.subr.bf16.mxu0 %v578_v6  ;;  %v221_v11 = vld [vmem:[%s208_s10] sm:$0x77] }
  0x12   : > { %v506_v12 = vcombine.high %v221_v11, %v221_v11  ;;  %v505_v18 = vcombine.low %v221_v11, %v221_v11 }
  0x14   : > { %533 = vmatpush3.bf16.msra.mxu0 %v579_v7  ;;  %390 = vmatprep.mubr.bf16.mxu0 %v506_v12 }
  0x15   : > { %534 = vmatprep.subr.bf16.mxu0 %v580_v8 }
  0x18   : > { %535 = vmatpush3.bf16.msra.mxu0 %v581_v9 }
  0x19   : > { %536 = vmatprep.subr.bf16.mxu0 %v582_v10 }
  0x1c   : > { %537 = vmatpush3.bf16.msra.mxu0 %v583_v13 }
  0x1d   : > { %538 = vmatprep.subr.bf16.mxu0 %v584_v14 }
  0x20   : > { %539 = vmatpush3.bf16.msra.mxu0 %v585_v15 }
  0x21   : > { %540 = vmatprep.subr.bf16.mxu0 %v586_v16 }
  0x24   : > { %541 = vmatpush3.bf16.msra.mxu0 %v587_v17 }
  0x27   : > { %391 = vmatmul.mubr.bf16.vlgmr.msra.gmra.mrb[0].mxu0 %v505_v18 }
  0xfa   : > { %v542_v19 = vpop.f32.mrb[0].mxu0 }
  0xfb   : > { %v543_v21 = vpop.f32.mrb[1].mxu0 }
  0xfc   : > { %v544_v22 = vadd.f32 %v543_v21, %v542_v19  ;;  %v545_v23 = vpop.f32.mrb[2].mxu0 }
  0xfd   : > { %v546_v24 = vpop.f32.mrb[3].mxu0 }
  0xfe   : > { %v393_v25 = vadd.f32 %v544_v22, %v254_v20 }
 0x100   : > { %399 = vst.msk [vmem:[%s219_s7] sm:$0x1f] %vm398_vm0, %v393_v25 }
 0x101 PF: > { %s13_s14 = sadd.s32 1, %s612_s14   ;;  %s729_s12 = smov %s608_s13 }
 0x102   : > { %p10_p5 = scmp.ge.s32.totalorder %s13_s14, 4   ;;  %s730_s13 = smov %s732_s15 }
 0x104   :  { %12 = sbr.rel (!%p10_p5) target bundleno = 2 (0x2), region = 65 }

</bundles_post_ra>
